<compile_context>
chip_gen: v6e
topology: v6e:2x2x1
jax: 0.10.0
libtpu: 0.0.40
codegen_flags: <defaults>
</compile_context>

<pallas_src>
import jax
import jax.numpy as jnp
from jax.experimental import pallas as pl
from jax.experimental.pallas import tpu as pltpu


def _multi_genpool_kernel(feat_ref, mbias_ref, w1_ref, b1_ref, w2_ref, b2_ref,
                          out_ref):
    """One grid step: TB batch elements, all P pools.

    feat_ref  : (TB, S, D)       bf16 features (S padded to a multiple of 16)
    mbias_ref : (TB, S, 1)       bf16 additive mask bias (0 or -1e30)
    w1_ref    : (D, P*H*dh)      bf16 first projection, fused across pools
    b1_ref    : (1, P*H*dh)      f32
    w2_ref    : (P, H*dh, D)     bf16 block-diagonal (head-major) second proj.
    b2_ref    : (P, 1, D)        f32
    out_ref   : (TB, P*D)        f32 pooled vectors, final layout
    """
    tb, s, d = feat_ref.shape
    n_pools = w2_ref.shape[0]
    hdh = w2_ref.shape[1]

    x_bf = feat_ref[...]                          # (TB, S, D) bf16
    x2 = x_bf.reshape(tb * s, d)                  # layout-preserving (S % 16 == 0)
    mbias = mbias_ref[...].astype(jnp.float32)    # (TB, S, 1) f32, hoisted once

    # First projection for ALL pools in one wide MXU pass; relu + bias in f32,
    # then one bf16 cast so the second matmul is a single-pass bf16 MXU dot.
    a_all = jnp.dot(x2, w1_ref[...], preferred_element_type=jnp.float32)
    a_bf = jnp.maximum(a_all + b1_ref[...], 0.0).astype(jnp.bfloat16)  # (TB*S, P*Hdh)

    parts = []
    for p in range(n_pools):                      # static, small P
        a_p = a_bf[:, p * hdh:(p + 1) * hdh]      # (TB*S, Hdh) static lane slice

        # sc = a @ W2_blockdiag + b2 -> (TB*S, D), head-major columns.
        sc = jnp.dot(a_p, w2_ref[p], preferred_element_type=jnp.float32) + b2_ref[p]

        # additive mask (-1e30) + softmax over the sequence axis
        sc = sc.reshape(tb, s, d) + mbias                      # (TB, S, D)
        mx = jnp.max(sc, axis=1, keepdims=True)                # (TB, 1, D)
        ex = jnp.exp(sc - mx)                                  # (TB, S, D)

        # f32 cast of x fused here (no standing x_f32 buffer).
        num = jnp.sum(x_bf.astype(jnp.float32) * ex, axis=1)   # (TB, D)
        den = jnp.sum(ex, axis=1)                              # (TB, D)
        parts.append(num * pl.reciprocal(den, approx=True))    # (TB, D)

    pooled = parts[0] if n_pools == 1 else jnp.concatenate(parts, axis=-1)
    out_ref[...] = pooled                                      # (TB, P*D) dense store


def _round_up(x, m):
    return ((x + m - 1) // m) * m


def _tensorcores_per_chip():
    """Best-effort: v7x-class chips have 2 TensorCores/chip, v5e/v6e have 1."""
    try:
        kind = jax.devices()[0].device_kind.lower()
    except Exception:
        return 1
    return 2 if "7" in kind else 1


def _per_batch_bytes(s_pad, d, p, hdh):
    """Rough per-batch-element VMEM bytes for one grid step."""
    return (16 * s_pad * d            # 2x bf16 double-buffered feature + f32 x/sc/ex temps
            + 6 * s_pad * p * hdh     # first-matmul activations (f32 acc + bf16 copy)
            + 4 * s_pad * 128         # lane-padded (tb,S,1) bf16 mask block, double-buffered
            + 8 * p * d)              # output block


def _fixed_bytes(d, p, hdh):
    """VMEM-resident weight bytes (double-buffered) + misc headroom."""
    return 8 * p * d * hdh + 8 * p * (hdh + d) + (2 << 20)


def _pick_batch_tile(batch, per_b, fixed, budget, num_cores):
    tb = int(max(1, (budget - fixed) // per_b))
    if tb >= batch:
        # Whole batch fits in one step.  Only split for multi-TensorCore chips.
        if num_cores > 1 and batch >= 16:
            return max(8, ((batch // num_cores) // 8) * 8)
        return batch
    # Multiple steps: keep the tile a multiple of 8 so the 2-D output block's
    # second-minor dim stays (8,128)-tile aligned and stores are sublane-dense.
    return max(8, (tb // 8) * 8)


def multi_gen_pool(features, mask, w1, b1, w2, b2, *, batch_tile=None,
                   vmem_limit_bytes=None, vmem_budget_bytes=40 << 20):
    """Pallas MultiGenPool.

    features : (B, S, D) float32
    mask     : (B, S)    bool   (True = masked / ignore)
    w1       : (P, H, D, dh)
    b1       : (P, H, dh)
    w2       : (P, H, dh, dho)    with dho = D // H
    b2       : (P, H, dho)
    returns  : (B, P * D) float32  -- per-pool pooled vectors concatenated.
    """
    P, H, D, dh = w1.shape
    dho = w2.shape[-1]
    B, S, _ = features.shape
    assert H * dho == D
    Hdh = H * dh

    # --- fused / head-major parameter layout (built once, outside the kernel)
    # W1_all: (P, H, D, dh) -> (D, P*H*dh); column p*Hdh + h*dh + j = w1[p,h,:,j]
    w1_all = jnp.transpose(w1, (2, 0, 1, 3)).reshape(D, P * Hdh)
    b1_all = b1.reshape(1, P * Hdh).astype(jnp.float32)
    # W2: block-diagonal (P, H*dh, D); column d = h*dho + o is head-major,
    # matching the transpose(1,2).reshape channel layout of the reference.
    eye = jnp.eye(H, dtype=w2.dtype)
    w2bd = jnp.einsum('phio,hg->phigo', w2, eye).reshape(P, Hdh, H * dho)
    b2f = b2.reshape(P, 1, D).astype(jnp.float32)

    # --- pad S to a multiple of 16 (bf16 sublane tile) so the in-kernel
    # (tb,S,D)->(tb*S,D) reshape is free; padded rows are fully masked.
    S_pad = _round_up(S, 16)
    if S_pad != S:
        features = jnp.pad(features, ((0, 0), (0, S_pad - S), (0, 0)))
        mask = jnp.pad(mask, ((0, 0), (0, S_pad - S)), constant_values=True)

    # --- batch tile from the VMEM byte model (and pad B to a multiple of it).
    per_b = _per_batch_bytes(S_pad, D, P, Hdh)
    fixed = _fixed_bytes(D, P, Hdh)
    if batch_tile is not None:
        tb = int(batch_tile)
    else:
        tb = _pick_batch_tile(B, per_b, fixed, vmem_budget_bytes,
                              _tensorcores_per_chip())
    B_pad = _round_up(B, tb)
    assert tb == B_pad or tb % 8 == 0, (
        "batch_tile must be a multiple of 8 or cover the whole (padded) batch")
    if B_pad != B:
        features = jnp.pad(features, ((0, B_pad - B), (0, 0), (0, 0)))
        mask = jnp.pad(mask, ((0, B_pad - B), (0, 0)), constant_values=True)

    # --- always set the scoped-VMEM limit from the block shapes (do not rely
    # on the 16/32 MiB defaults); keep it within the v7x 64 MiB physical budget
    # for typical tiles.
    est = fixed + tb * per_b
    if vmem_limit_bytes is None:
        vmem_limit_bytes = int(min(max(32 << 20, est + (8 << 20)), 100 << 20))

    # bf16 HBM stream for the large operands; f32 accumulation in-kernel.
    feat_bf = features.astype(jnp.bfloat16)
    w1_all = w1_all.astype(jnp.bfloat16)
    w2bd = w2bd.astype(jnp.bfloat16)
    # Additive softmax mask; finite -1e30 also guards fully-masked rows.  bf16
    # halves the lane-padded (tb, S, 1) VMEM block.
    mask_bias = jnp.where(mask, -1e30, 0.0).astype(jnp.bfloat16)[..., None]

    out = pl.pallas_call(
        _multi_genpool_kernel,
        out_shape=jax.ShapeDtypeStruct((B_pad, P * D), jnp.float32),
        grid=(B_pad // tb,),
        in_specs=[
            # features / mask: streamed once per batch tile.
            pl.BlockSpec((tb, S_pad, D), lambda b: (b, 0, 0)),
            pl.BlockSpec((tb, S_pad, 1), lambda b: (b, 0, 0)),
            # all P pools' weights: constant index_map -> stay VMEM-resident
            # (Pallas skips the re-fetch when the block index does not change).
            pl.BlockSpec((D, P * Hdh), lambda b: (0, 0)),
            pl.BlockSpec((1, P * Hdh), lambda b: (0, 0)),
            pl.BlockSpec((P, Hdh, D), lambda b: (0, 0, 0)),
            pl.BlockSpec((P, 1, D), lambda b: (0, 0, 0)),
        ],
        out_specs=pl.BlockSpec((tb, P * D), lambda b: (b, 0)),
        compiler_params=pltpu.CompilerParams(
            dimension_semantics=("parallel",),
            vmem_limit_bytes=vmem_limit_bytes),
    )(feat_bf, mask_bias, w1_all, b1_all, w2bd, b2f)

    return out[:B]


def _reference(features, mask, w1, b1, w2, b2):
    """Pure-JAX reference mirroring the PyTorch math (eval mode)."""
    B, S, D = features.shape
    outs = []
    for p in range(w1.shape[0]):
        s = jnp.einsum("bsd,hde->bhse", features, w1[p]) + b1[p][None, :, None, :]
        s = jnp.maximum(s, 0.0)
        s = jnp.einsum("bhse,heo->bhso", s, w2[p]) + b2[p][None, :, None, :]
        s = jnp.where(mask[:, None, :, None], -jnp.inf, s)
        sm = jax.nn.softmax(s, axis=2)
        smw = jnp.transpose(sm, (0, 2, 1, 3)).reshape(B, S, D)
        outs.append((features * smw).sum(axis=1))
    return jnp.concatenate(outs, axis=-1)


if __name__ == "__main__":
    # Small config: n_pools=2, d_input=32, d_attn=16, n_heads=4,
    # dropout=0.0 (eval), activation="relu".
    P, B, S, D = 2, 4, 8, 32
    H, D_ATTN = 4, 16
    dh, dho = D_ATTN // H, D // H

    key = jax.random.PRNGKey(0)
    kf, k1, k2, k3, k4 = jax.random.split(key, 5)

    features = jax.random.normal(kf, (B, S, D), dtype=jnp.float32)
    # Deterministic (non-zero) parameter init; module __init__ only fixes shapes.
    w1 = 0.1 * jax.random.normal(k1, (P, H, D, dh), dtype=jnp.float32)
    b1 = 0.1 * jax.random.normal(k2, (P, H, dh), dtype=jnp.float32)
    w2 = 0.1 * jax.random.normal(k3, (P, H, dh, dho), dtype=jnp.float32)
    b2 = 0.1 * jax.random.normal(k4, (P, H, dho), dtype=jnp.float32)

    # mask: True = position is padding (masked out)
    lengths = jnp.array([8, 5, 3, 8], dtype=jnp.int32)
    mask = jnp.arange(S)[None, :] >= lengths[:, None]          # (B, S) bool

    pooled = multi_gen_pool(features, mask, w1, b1, w2, b2)
    jax.block_until_ready(pooled)

    # Reference on the same bf16-rounded streamed operands (f32 math),
    # so the comparison isolates kernel correctness from the bf16 cast.
    f_r = features.astype(jnp.bfloat16).astype(jnp.float32)
    w1_r = w1.astype(jnp.bfloat16).astype(jnp.float32)
    w2_r = w2.astype(jnp.bfloat16).astype(jnp.float32)
    ref = _reference(f_r, mask, w1_r, b1, w2_r, b2)

    assert pooled.shape == (B, P * D)
    err = jnp.max(jnp.abs(pooled - ref))
    assert jnp.allclose(pooled, ref, atol=1e-2, rtol=1e-2), f"max err {err}"
    print("KERNEL_OK")
</pallas_src>

<mosaic_0001>
module attributes {stable_mosaic.version = 11 : i64} {
  func.func @_multi_genpool_kernel(%arg0: i32, %arg1: memref<4x16x32xbf16, #tpu.memory_space<vmem>>, %arg2: memref<4x16x1xbf16, #tpu.memory_space<vmem>>, %arg3: memref<32x32xbf16, #tpu.memory_space<vmem>>, %arg4: memref<1x32xf32, #tpu.memory_space<vmem>>, %arg5: memref<2x16x32xbf16, #tpu.memory_space<vmem>>, %arg6: memref<2x1x32xf32, #tpu.memory_space<vmem>>, %arg7: memref<4x64xf32, #tpu.memory_space<vmem>>) attributes {dimension_semantics = [#tpu.dimension_semantics<parallel>], iteration_bounds = array<i64: 1>, scalar_prefetch = 0 : i64, scratch_operands = 0 : i64, tpu.core_type = #tpu.core_type<tc>, window_params = [{transform_indices = @transform_0, window_bounds = array<i64: 4, 16, 32>}, {transform_indices = @transform_1, window_bounds = array<i64: 4, 16, 1>}, {pipeline_mode = #tpu.pipeline_mode<synchronous>, transform_indices = @transform_2, window_bounds = array<i64: 32, 32>}, {pipeline_mode = #tpu.pipeline_mode<synchronous>, transform_indices = @transform_3, window_bounds = array<i64: 1, 32>}, {pipeline_mode = #tpu.pipeline_mode<synchronous>, transform_indices = @transform_4, window_bounds = array<i64: 2, 16, 32>}, {pipeline_mode = #tpu.pipeline_mode<synchronous>, transform_indices = @transform_5, window_bounds = array<i64: 2, 1, 32>}, {transform_indices = @transform_6, window_bounds = array<i64: 4, 64>}]} {
    %c0 = arith.constant 0 : index
    %c0_0 = arith.constant 0 : index
    %c0_1 = arith.constant 0 : index
    %0 = vector.load %arg1[%c0, %c0_0, %c0_1] : memref<4x16x32xbf16, #tpu.memory_space<vmem>>, vector<4x16x32xbf16>
    %1 = vector.shape_cast %0 : vector<4x16x32xbf16> to vector<64x32xbf16>
    %c0_2 = arith.constant 0 : index
    %c0_3 = arith.constant 0 : index
    %c0_4 = arith.constant 0 : index
    %2 = vector.load %arg2[%c0_2, %c0_3, %c0_4] : memref<4x16x1xbf16, #tpu.memory_space<vmem>>, vector<4x16x1xbf16>
    %3 = arith.extf %2 : vector<4x16x1xbf16> to vector<4x16x1xf32>
    %c0_5 = arith.constant 0 : index
    %c0_6 = arith.constant 0 : index
    %4 = vector.load %arg3[%c0_5, %c0_6] : memref<32x32xbf16, #tpu.memory_space<vmem>>, vector<32x32xbf16>
    %cst = arith.constant dense<0.000000e+00> : vector<64x32xf32>
    %5 = tpu.matmul %1, %4, %cst {dimension_numbers = #tpu.dot_dimension_numbers<[1], [0], [0], [1], [0, 0, 1, 1], [], []>} : vector<64x32xbf16>, vector<32x32xbf16>, vector<64x32xf32> -> vector<64x32xf32>
    %c0_7 = arith.constant 0 : index
    %c0_8 = arith.constant 0 : index
    %6 = vector.load %arg4[%c0_7, %c0_8] : memref<1x32xf32, #tpu.memory_space<vmem>>, vector<1x32xf32>
    %7 = vector.broadcast %6 : vector<1x32xf32> to vector<64x32xf32>
    %8 = arith.addf %5, %7 : vector<64x32xf32>
    %cst_9 = arith.constant 0.000000e+00 : f32
    %9 = vector.broadcast %cst_9 : f32 to vector<64x32xf32>
    %10 = arith.maximumf %8, %9 : vector<64x32xf32>
    %11 = arith.truncf %10 : vector<64x32xf32> to vector<64x32xbf16>
    %12 = vector.extract_strided_slice %11 {offsets = [0, 0], sizes = [64, 16], strides = [1, 1]} : vector<64x32xbf16> to vector<64x16xbf16>
    %c0_10 = arith.constant 0 : index
    %c0_11 = arith.constant 0 : index
    %c0_12 = arith.constant 0 : index
    %13 = vector.load %arg5[%c0_10, %c0_11, %c0_12] : memref<2x16x32xbf16, #tpu.memory_space<vmem>>, vector<1x16x32xbf16>
    %14 = vector.shape_cast %13 : vector<1x16x32xbf16> to vector<16x32xbf16>
    %cst_13 = arith.constant dense<0.000000e+00> : vector<64x32xf32>
    %15 = tpu.matmul %12, %14, %cst_13 {dimension_numbers = #tpu.dot_dimension_numbers<[1], [0], [0], [1], [0, 0, 1, 1], [], []>} : vector<64x16xbf16>, vector<16x32xbf16>, vector<64x32xf32> -> vector<64x32xf32>
    %c0_14 = arith.constant 0 : index
    %c0_15 = arith.constant 0 : index
    %c0_16 = arith.constant 0 : index
    %16 = vector.load %arg6[%c0_14, %c0_15, %c0_16] : memref<2x1x32xf32, #tpu.memory_space<vmem>>, vector<1x1x32xf32>
    %17 = vector.shape_cast %16 : vector<1x1x32xf32> to vector<1x32xf32>
    %18 = vector.broadcast %17 : vector<1x32xf32> to vector<64x32xf32>
    %19 = arith.addf %15, %18 : vector<64x32xf32>
    %20 = vector.shape_cast %19 : vector<64x32xf32> to vector<4x16x32xf32>
    %21 = vector.broadcast %3 : vector<4x16x1xf32> to vector<4x16x32xf32>
    %22 = arith.addf %20, %21 : vector<4x16x32xf32>
    %cst_17 = arith.constant dense<0xFF800000> : vector<4x32xf32>
    %23 = vector.multi_reduction <maximumf>, %22, %cst_17 [1] : vector<4x16x32xf32> to vector<4x32xf32>
    %24 = vector.shape_cast %23 : vector<4x32xf32> to vector<4x1x32xf32>
    %25 = vector.broadcast %24 : vector<4x1x32xf32> to vector<4x16x32xf32>
    %26 = arith.subf %22, %25 : vector<4x16x32xf32>
    %27 = math.exp %26 : vector<4x16x32xf32>
    %28 = arith.extf %0 : vector<4x16x32xbf16> to vector<4x16x32xf32>
    %29 = arith.mulf %28, %27 : vector<4x16x32xf32>
    %cst_18 = arith.constant dense<0.000000e+00> : vector<4x32xf32>
    %30 = vector.multi_reduction <add>, %29, %cst_18 [1] : vector<4x16x32xf32> to vector<4x32xf32>
    %cst_19 = arith.constant dense<0.000000e+00> : vector<4x32xf32>
    %31 = vector.multi_reduction <add>, %27, %cst_19 [1] : vector<4x16x32xf32> to vector<4x32xf32>
    %32 = tpu.reciprocal %31 {approx = true} : vector<4x32xf32> -> vector<4x32xf32>
    %33 = arith.mulf %30, %32 : vector<4x32xf32>
    %34 = vector.extract_strided_slice %11 {offsets = [0, 16], sizes = [64, 16], strides = [1, 1]} : vector<64x32xbf16> to vector<64x16xbf16>
    %c1 = arith.constant 1 : index
    %c0_20 = arith.constant 0 : index
    %c0_21 = arith.constant 0 : index
    %35 = vector.load %arg5[%c1, %c0_20, %c0_21] : memref<2x16x32xbf16, #tpu.memory_space<vmem>>, vector<1x16x32xbf16>
    %36 = vector.shape_cast %35 : vector<1x16x32xbf16> to vector<16x32xbf16>
    %cst_22 = arith.constant dense<0.000000e+00> : vector<64x32xf32>
    %37 = tpu.matmul %34, %36, %cst_22 {dimension_numbers = #tpu.dot_dimension_numbers<[1], [0], [0], [1], [0, 0, 1, 1], [], []>} : vector<64x16xbf16>, vector<16x32xbf16>, vector<64x32xf32> -> vector<64x32xf32>
    %c1_23 = arith.constant 1 : index
    %c0_24 = arith.constant 0 : index
    %c0_25 = arith.constant 0 : index
    %38 = vector.load %arg6[%c1_23, %c0_24, %c0_25] : memref<2x1x32xf32, #tpu.memory_space<vmem>>, vector<1x1x32xf32>
    %39 = vector.shape_cast %38 : vector<1x1x32xf32> to vector<1x32xf32>
    %40 = vector.broadcast %39 : vector<1x32xf32> to vector<64x32xf32>
    %41 = arith.addf %37, %40 : vector<64x32xf32>
    %42 = vector.shape_cast %41 : vector<64x32xf32> to vector<4x16x32xf32>
    %43 = vector.broadcast %3 : vector<4x16x1xf32> to vector<4x16x32xf32>
    %44 = arith.addf %42, %43 : vector<4x16x32xf32>
    %cst_26 = arith.constant dense<0xFF800000> : vector<4x32xf32>
    %45 = vector.multi_reduction <maximumf>, %44, %cst_26 [1] : vector<4x16x32xf32> to vector<4x32xf32>
    %46 = vector.shape_cast %45 : vector<4x32xf32> to vector<4x1x32xf32>
    %47 = vector.broadcast %46 : vector<4x1x32xf32> to vector<4x16x32xf32>
    %48 = arith.subf %44, %47 : vector<4x16x32xf32>
    %49 = math.exp %48 : vector<4x16x32xf32>
    %50 = arith.extf %0 : vector<4x16x32xbf16> to vector<4x16x32xf32>
    %51 = arith.mulf %50, %49 : vector<4x16x32xf32>
    %cst_27 = arith.constant dense<0.000000e+00> : vector<4x32xf32>
    %52 = vector.multi_reduction <add>, %51, %cst_27 [1] : vector<4x16x32xf32> to vector<4x32xf32>
    %cst_28 = arith.constant dense<0.000000e+00> : vector<4x32xf32>
    %53 = vector.multi_reduction <add>, %49, %cst_28 [1] : vector<4x16x32xf32> to vector<4x32xf32>
    %54 = tpu.reciprocal %53 {approx = true} : vector<4x32xf32> -> vector<4x32xf32>
    %55 = arith.mulf %52, %54 : vector<4x32xf32>
    %56 = tpu.concatenate %33, %55 in 1 : vector<4x32xf32>, vector<4x32xf32> -> vector<4x64xf32>
    %c0_29 = arith.constant 0 : index
    %c0_30 = arith.constant 0 : index
    %57 = vector.load %arg7[%c0_29, %c0_30] : memref<4x64xf32, #tpu.memory_space<vmem>>, vector<4x64xf32>
    tpu.vector_store %arg7[%c0_29, %c0_30], %56 {strides = array<i32>} : memref<4x64xf32, #tpu.memory_space<vmem>>, vector<4x64xf32>,
    return
  }
  func.func @transform_0(%arg0: i32) -> (i32, i32, i32) {
    %c0_i32 = arith.constant 0 : i32
    %c0_i32_0 = arith.constant 0 : i32
    %c0_i32_1 = arith.constant 0 : i32
    return %arg0, %c0_i32, %c0_i32_0 : i32, i32, i32
  }
  func.func @transform_1(%arg0: i32) -> (i32, i32, i32) {
    %c0_i32 = arith.constant 0 : i32
    %c0_i32_0 = arith.constant 0 : i32
    %c0_i32_1 = arith.constant 0 : i32
    return %arg0, %c0_i32, %c0_i32_0 : i32, i32, i32
  }
  func.func @transform_2(%arg0: i32) -> (i32, i32) {
    %c0_i32 = arith.constant 0 : i32
    %c0_i32_0 = arith.constant 0 : i32
    %c0_i32_1 = arith.constant 0 : i32
    return %c0_i32, %c0_i32_0 : i32, i32
  }
  func.func @transform_3(%arg0: i32) -> (i32, i32) {
    %c0_i32 = arith.constant 0 : i32
    %c0_i32_0 = arith.constant 0 : i32
    %c0_i32_1 = arith.constant 0 : i32
    return %c0_i32, %c0_i32_0 : i32, i32
  }
  func.func @transform_4(%arg0: i32) -> (i32, i32, i32) {
    %c0_i32 = arith.constant 0 : i32
    %c0_i32_0 = arith.constant 0 : i32
    %c0_i32_1 = arith.constant 0 : i32
    %c0_i32_2 = arith.constant 0 : i32
    return %c0_i32, %c0_i32_0, %c0_i32_1 : i32, i32, i32
  }
  func.func @transform_5(%arg0: i32) -> (i32, i32, i32) {
    %c0_i32 = arith.constant 0 : i32
    %c0_i32_0 = arith.constant 0 : i32
    %c0_i32_1 = arith.constant 0 : i32
    %c0_i32_2 = arith.constant 0 : i32
    return %c0_i32, %c0_i32_0, %c0_i32_1 : i32, i32, i32
  }
  func.func @transform_6(%arg0: i32) -> (i32, i32) {
    %c0_i32 = arith.constant 0 : i32
    %c0_i32_0 = arith.constant 0 : i32
    return %arg0, %c0_i32 : i32, i32
  }
}

</mosaic_0001>

<bundles_post_ra>
// kernel: tpu_custom_call.1
= control target key start
LH: loop header
LB: loop body
LE: loop exit
PB: predicated region body
PF: predicated region fallthrough
CT: control target
= control target key end

     0   :  { %11 = vsyncpa [#allocation3], 0  ;;  %s1313_s0 = inlined_call_operand.vmem [shape: bf16[4,16,32], index: 0, kind: input, shape index: {}]   ;;  %s1314_s1 = inlined_call_operand.vmem [shape: bf16[4,16,1], index: 1, kind: input, shape index: {}]   ;;  %s1315_s2 = inlined_call_operand.hbm [shape: bf16[32,32], index: 2, kind: input, shape index: {}]   ;;  %s1316_s3 = inlined_call_operand.vmem [shape: f32[1,32], index: 3, kind: input, shape index: {}]   ;;  %s1317_s4 = inlined_call_operand.hbm [shape: bf16[2,16,32], index: 4, kind: input, shape index: {}]   ;;  %s1318_s5 = inlined_call_operand.vmem [shape: f32[2,1,32], index: 5, kind: input, shape index: {}]   ;;  %s1319_s6 = inlined_call_operand.hbm [shape: f32[4,64], index: 6, kind: output, shape index: {}]  }
   0x1   :  { %12 = vsyncpa [#allocation6], 0 }
   0x2   :  { %13 = vsyncpa [#allocation4], 0  ;;  %s1058_s21 = smov [#allocation2]  }
   0x3   :  { %s23_s22 = sshll.u32 %s1058_s21, 4  ;;  %s24_s22 = int_to_ptr.vmem [resolvable:$true] %s23_s22 }
   0x4   :  { %s1000_s23 = scalar_lea.vmem %s24_s22, 256  ;;  %p1005_p1 = scmp.lt.s32.totalorder %s24_s22, %s24_s22 }
   0x5   :  { %p1001_p0 = scmp.ne.s32.totalorder %s24_s22, %s1000_s23  ;;  %p1006_p2 = scmp.lt.s32.totalorder %s1000_s23, %s1000_s23 }
   0x7   :  { %p1007_p3 = por %p1006_p2, %p1005_p1 }
   0x9   :  { %p1008_p4 = pnand %p1007_p3, %p1001_p0 }
   0xb   :  { %1011 = shalt.err (!%p1008_p4)
}
   0xc   :  { %s1059_s24 = smov 64   ;;  %s1060_s25 = smov 4  }
   0xd   :  { %29 = dma.hbm_to_vmem [thread:$0]  %s1315_s2, 256, %s24_s22, [#allocation3], %s1059_s24, %s1059_s24, %s1060_s25  }
   0xe   :  { %s1061_s28 = smov [#allocation5]  }
   0xf   :  { %s37_s29 = sshll.u32 %s1061_s28, 4  ;;  %s38_s29 = int_to_ptr.vmem [resolvable:$true] %s37_s29 }
  0x10   :  { %s1020_s30 = scalar_lea.vmem %s38_s29, 256  ;;  %p1025_p6 = scmp.lt.s32.totalorder %s38_s29, %s38_s29 }
  0x11   :  { %p1021_p5 = scmp.ne.s32.totalorder %s38_s29, %s1020_s30  ;;  %p1026_p7 = scmp.lt.s32.totalorder %s1020_s30, %s1020_s30 }
  0x13   :  { %p1027_p8 = por %p1026_p7, %p1025_p6 }
  0x15   :  { %p1028_p9 = pnand %p1027_p8, %p1021_p5 }
  0x17   :  { %1031 = shalt.err (!%p1028_p9)
}
  0x18   :  { %43 = dma.hbm_to_vmem [thread:$0]  %s1317_s4, 256, %s38_s29, [#allocation6], %s1059_s24, %s1059_s24, %s1060_s25  }
  0x19   :  { %1052 = dma.done.wait [#allocation3], 256  }
  0x1a   :  { %1053 = vsyncadd [#allocation3], 4294967040 }
  0x1b   :  { %1054 = dma.done.wait [#allocation6], 256  }
  0x1c   :  { %1055 = vsyncadd [#allocation6], 4294967040  ;;  %v932_v0 = vld [vmem:[#allocation2 + $0x8] sm:$0xff]   ;;  %v933_v1 = vld [vmem:[#allocation2] sm:$0xff]   ;;  %vm120_vm0 = vcmask 261120   ;;  %v1062_v7 = vmov 0  }
  0x1d   :  { %868 = vmatprep.subr.bf16.mxu0 %v932_v0  ;;  %v1110_v2 = vld [vmem:[%s1313_s0] sm:$0xff]   ;;  %v1115_v3 = vld [vmem:[%s1313_s0 + $0x8] sm:$0xff]   ;;  %v1120_v4 = vld [vmem:[%s1313_s0 + $0x10] sm:$0xff]   ;;  %916 = vset.pattern.permute.xlu1 %v1062_v7  ;;  %vm225_vm1 = vcmask 130048   ;;  %vm773_vm2 = vcmask 1041409   ;;  %vm775_vm3 = vcmask 1042434  }
  0x1e   :  { %869 = vmatpush3.bf16.msra.mxu0 %v932_v0  ;;  %872 = vmatprep.mubr.msk.bf16.mxu0 %vm120_vm0, %v1110_v2  ;;  %v1131_v5 = vld [vmem:[%s1313_s0 + $0x18] sm:$0xff]   ;;  %v938_v6 = vld [vmem:[#allocation5] sm:$0xff]   ;;  %v809_v11 = vld [vmem:[%s1316_s3] ss:$0 sm:$0xff]  ;;  %s1063_s3 = smov 112   ;;  %vm777_vm4 = vcmask 1043459  }
  0x1f   :  { %870 = vmatprep.subr.bf16.mxu0 %v933_v1  ;;  %900 = vmatprep.subr.bf16.mxu1 %v938_v6  ;;  %v939_v8 = vld [vmem:[#allocation5 + $0x8] sm:$0xff]   ;;  %v834_v25 = vld [vmem:[%s1314_s1] sm:$0xff]   ;;  %v849_v40 = vld [vmem:[%s1314_s1 + $0x8] sm:$0xff]   ;;  %s1065_s27 = smov [#allocation7]   ;;  %vm791_vm5 = vcmask 519168  }
  0x20   :  { %901 = vmatpush3.bf16.msra.mxu1 %v938_v6  ;;  %910 = vset.pattern.permute.xlu0 %v1062_v7  ;;  %v835_v32 = vunpack.c.l.bf16 %v834_v25  ;;  %v836_v33 = vunpack.c.h.bf16 %v834_v25  ;;  %v851_v35 = vld [vmem:[%s1314_s1 + $0x18] sm:$0xff]   ;;  %v839_v46 = vunpack.c.l.bf16 %v849_v40  ;;  %v840_v47 = vunpack.c.h.bf16 %v849_v40  ;;  %v850_v49 = vld [vmem:[%s1314_s1 + $0x10] sm:$0xff]   ;;  %v820_v59 = vld [vmem:[%s1318_s5] ss:$0 sm:$0xff]  ;;  %s799_s28 = sshll.u32 %s1065_s27, 4  ;;  %s800_s28 = int_to_ptr.vmem [resolvable:$true] %s799_s28 }
  0x21   :  { %890 = vmatprep.subr.bf16.mxu1 %v939_v8  ;;  %v847_v42 = vunpack.c.l.bf16 %v851_v35  ;;  %v848_v43 = vunpack.c.h.bf16 %v851_v35  ;;  %v843_v51 = vunpack.c.l.bf16 %v850_v49  ;;  %v844_v52 = vunpack.c.h.bf16 %v850_v49  ;;  %s1032_s29 = scalar_lea.vmem %s800_s28, 64  ;;  %p1037_p11 = scmp.lt.s32.totalorder %s800_s28, %s800_s28 }
  0x22   :  { %871 = vmatpush3.bf16.msra.mxu0 %v933_v1  ;;  %v911_v41 = vpack.i.bf16 %v836_v33, %v835_v32  ;;  %v917_v50 = vpack.i.bf16 %v840_v47, %v839_v46  ;;  %p1033_p10 = scmp.ne.s32.totalorder %s800_s28, %s1032_s29  ;;  %p1038_p12 = scmp.lt.s32.totalorder %s1032_s29, %s1032_s29 }
  0x23   :  { %880 = vmatprep.subr.bf16.mxu0 %v938_v6  ;;  %v927_v48 = vpack.i.bf16 %v848_v43, %v847_v42  ;;  %v922_v53 = vpack.i.bf16 %v844_v52, %v843_v51 }
  0x24   :  { %p1039_p13 = por %p1038_p12, %p1037_p11 }
  0x25   :  { %873 = vmatmul.mubr.msk.bf16.vlgmr.msra.gmra.mxu0 %vm120_vm0, %v1115_v3 }
  0x26   :  { %876 = vmatprep.mubr.msk.bf16.mxu0 %vm120_vm0, %v1120_v4  ;;  %881 = vmatpush3.bf16.msra.mxu0 %v938_v6  ;;  %p1040_p0 = pnand %p1039_p13, %p1033_p10 }
  0x2d   :  { %877 = vmatmul.mubr.msk.bf16.gmra.mxu0 %vm120_vm0, %v1131_v5 }
  0xe5   :  { %v874_v9 = vpop.f32.mrf.mxu0 }
  0xe6   :  { %v176_v15 = vadd.f32 %v874_v9, %v809_v11 }
  0xe7   :  { %v167_v10 = vpop.f32.mrf.mxu0 }
  0xe8   :  { %v168_v13 = vadd.f32 %v809_v11, %v167_v10  ;;  %v200_v22 = vmax.f32 %v176_v15, 0.0 }
  0xe9   :  { %v875_v12 = vpop.f32.mrf.mxu0 }
  0xea   :  { %v179_v14 = vadd.f32 %v875_v12, %v809_v11  ;;  %v198_v20 = vmax.f32 %v168_v13, 0.0 }
  0xeb   :  { %v170_v16 = vpop.f32.mrf.mxu0 }
  0xec   :  { %v171_v17 = vadd.f32 %v809_v11, %v170_v16  ;;  %v201_v18 = vmax.f32 %v179_v14, 0.0 }
  0xed   :  { %v878_v19 = vpop.f32.mrf.mxu0 }
  0xee   :  { %v199_v21 = vmax.f32 %v171_v17, 0.0  ;;  %v207_v26 = vpack.c.bf16 %v201_v18, %v200_v22  ;;  %v192_v30 = vadd.f32 %v878_v19, %v809_v11 }
  0xef   :  { %v183_v23 = vpop.f32.mrf.mxu0 }
  0xf0   :  { %v206_v24 = vpack.c.bf16 %v199_v21, %v198_v20  ;;  %v184_v28 = vadd.f32 %v809_v11, %v183_v23  ;;  %v204_v39 = vmax.f32 %v192_v30, 0.0 }
  0xf1   :  { %v879_v27 = vpop.f32.mrf.mxu0 }
  0xf2   :  { %v195_v29 = vadd.f32 %v879_v27, %v809_v11  ;;  %522 = vrot.lane.b32.xlu0 %v206_v24, %s1063_s3  ;;  %882 = vmatprep.mubr.msk.bf16.mxu0 %vm225_vm1, %v206_v24  ;;  %v202_v37 = vmax.f32 %v184_v28, 0.0 }
  0xf3   :  { %v186_v31 = vpop.f32.mrf.mxu0  ;;  %883 = vmatmul.mubr.msk.bf16.vlgmr.msra.gmra.mxu0 %vm225_vm1, %v207_v26 }
  0xf4   :  { %v187_v34 = vadd.f32 %v809_v11, %v186_v31  ;;  %v205_v36 = vmax.f32 %v195_v29, 0.0 }
  0xf6   :  { %v203_v38 = vmax.f32 %v187_v34, 0.0  ;;  %524 = vrot.lane.b32.xlu0 %v207_v26, %s1063_s3  ;;  %v209_v45 = vpack.c.bf16 %v205_v36, %v204_v39 }
  0xf8   :  { %v208_v44 = vpack.c.bf16 %v203_v38, %v202_v37 }
  0xfa   :  { %526 = vrot.lane.b32.xlu1 %v208_v44, %s1063_s3  ;;  %886 = vmatprep.mubr.msk.bf16.mxu1 %vm225_vm1, %v208_v44 }
  0xfb   :  { %887 = vmatmul.mubr.msk.bf16.vlgmr.msra.gmra.mxu1 %vm225_vm1, %v209_v45  ;;  %912 = vperm.xlu0 %910, %v911_v41  }
  0xfc   :  { %891 = vmatpush3.bf16.msra.mxu1 %v939_v8 }
  0xfe   :  { %528 = vrot.lane.b32.xlu1 %v209_v45, %s1063_s3 }
  0xff   :  { %928 = vperm.xlu0 %910, %v927_v48  }
 0x102   :  { %918 = vperm.xlu1 %916, %v917_v50  }
 0x106   :  { %923 = vperm.xlu1 %916, %v922_v53  }
 0x164   :  { %v523_v54 = vpop.permute.xlu0 %522 }
 0x165   :  { %892 = vmatprep.mubr.msk.bf16.mxu1 %vm225_vm1, %v523_v54 }
 0x168   :  { %v525_v55 = vpop.permute.xlu0 %524 }
 0x169   :  { %893 = vmatmul.mubr.msk.bf16.vlgmr.msra.gmra.mxu1 %vm225_vm1, %v525_v55 }
 0x16c   :  { %v527_v56 = vpop.permute.xlu1 %526 }
 0x16d   :  { %896 = vmatprep.mubr.msk.bf16.mxu1 %vm225_vm1, %v527_v56 }
 0x170   :  { %v529_v57 = vpop.permute.xlu1 %528 }
 0x171   :  { %897 = vmatmul.mubr.msk.bf16.gmra.mxu1 %vm225_vm1, %v529_v57 }
 0x176   :  { %v1163_v61 = vpop.permute.xlu0 %912 }
 0x177   :  { %v914_v6 = vunpack.i.l.bf16 %v1163_v61  ;;  %v915_v10 = vunpack.i.h.bf16 %v1163_v61 }
 0x17a   :  { %v1171_v12 = vpop.permute.xlu0 %928 }
 0x17b   :  { %v930_v18 = vunpack.i.l.bf16 %v1171_v12  ;;  %v931_v25 = vunpack.i.h.bf16 %v1171_v12 }
 0x17d   :  { %v1158_v58 = vpop.permute.xlu1 %918 }
 0x17e   :  { %v920_v62 = vunpack.i.l.bf16 %v1158_v58  ;;  %v921_v1 = vunpack.i.h.bf16 %v1158_v58 }
 0x181   :  { %v1178_v19 = vpop.permute.xlu1 %923 }
 0x182   :  { %v925_v29 = vunpack.i.l.bf16 %v1178_v19  ;;  %v926_v35 = vunpack.i.h.bf16 %v1178_v19 }
 0x1b3   :  { %v884_v60 = vpop.f32.mrf.mxu0 }
 0x1b4   :  { %v281_v63 = vadd.f32 %v884_v60, %v820_v59 }
 0x1b5   :  { %v272_v0 = vpop.f32.mrf.mxu0 }
 0x1b6   :  { %v273_v7 = vadd.f32 %v820_v59, %v272_v0  ;;  %v345_v9 = vadd.f32 %v920_v62, %v281_v63 }
 0x1b7   :  { %v885_v8 = vpop.f32.mrf.mxu0 }
 0x1b8   :  { %v284_v11 = vadd.f32 %v885_v8, %v820_v59  ;;  %v343_v14 = vadd.f32 %v914_v6, %v273_v7  ;;  %v360_v20 = vsel %vm120_vm0, %v345_v9, -inf }
 0x1b9   :  { %v275_v13 = vpop.f32.mrf.mxu0 }
 0x1ba   :  { %v346_v15 = vadd.f32 %v921_v1, %v284_v11  ;;  %v276_v16 = vadd.f32 %v820_v59, %v275_v13  ;;  %v351_v27 = vsel %vm120_vm0, %v343_v14, -inf }
 0x1bb   :  { %v888_v17 = vpop.f32.mrf.mxu1 }
 0x1bc   :  { %v361_v21 = vsel %vm120_vm0, %v346_v15, -inf  ;;  %v344_v22 = vadd.f32 %v915_v10, %v276_v16  ;;  %v297_v23 = vadd.f32 %v888_v17, %v820_v59 }
 0x1bd   :  { %v362_v24 = vmax.f32 %v360_v20, %v361_v21  ;;  %v288_v26 = vpop.f32.mrf.mxu1 }
 0x1be   :  { %v352_v28 = vsel %vm120_vm0, %v344_v22, -inf  ;;  %v289_v30 = vadd.f32 %v820_v59, %v288_v26  ;;  %v349_v34 = vadd.f32 %v930_v18, %v297_v23 }
 0x1bf   :  { %v363_v31 = vrot.slane %v362_v24, 4  ;;  %v353_v32 = vmax.f32 %v351_v27, %v352_v28  ;;  %v889_v33 = vpop.f32.mrf.mxu1 }
 0x1c0   :  { %v300_v36 = vadd.f32 %v889_v33, %v820_v59  ;;  %v347_v40 = vadd.f32 %v925_v29, %v289_v30  ;;  %v378_v45 = vsel %vm120_vm0, %v349_v34, -inf }
 0x1c1   :  { %v364_v37 = vmax.f32 %v362_v24, %v363_v31  ;;  %v354_v38 = vrot.slane %v353_v32, 4  ;;  %v291_v39 = vpop.f32.mrf.mxu1 }
 0x1c2   :  { %v350_v41 = vadd.f32 %v931_v25, %v300_v36  ;;  %v292_v42 = vadd.f32 %v820_v59, %v291_v39  ;;  %v369_v51 = vsel %vm120_vm0, %v347_v40, -inf }
 0x1c3   :  { %v365_v43 = vrot.slane %v364_v37, 2  ;;  %v355_v44 = vmax.f32 %v353_v32, %v354_v38 }
 0x1c4   :  { %v379_v46 = vsel %vm120_vm0, %v350_v41, -inf  ;;  %v348_v47 = vadd.f32 %v926_v35, %v292_v42 }
 0x1c5   :  { %v366_v48 = vmax.f32 %v364_v37, %v365_v43  ;;  %v356_v49 = vrot.slane %v355_v44, 2  ;;  %v380_v50 = vmax.f32 %v378_v45, %v379_v46  ;;  %v411_v43 = vunpack.c.l.bf16 %v1110_v2 }
 0x1c6   :  { %v370_v52 = vsel %vm120_vm0, %v348_v47, -inf  ;;  %v413_v46 = vunpack.c.l.bf16 %v1115_v3 }
 0x1c7   :  { %v367_v53 = vrot.slane %v366_v48, 1  ;;  %v357_v54 = vmax.f32 %v355_v44, %v356_v49  ;;  %v381_v55 = vrot.slane %v380_v50, 4  ;;  %v371_v56 = vmax.f32 %v369_v51, %v370_v52 }
 0x1c8   :  { %v412_v44 = vunpack.c.h.bf16 %v1110_v2 }
 0x1c9   :  { %v368_v57 = vmax.f32 %v366_v48, %v367_v53  ;;  %v358_v59 = vrot.slane %v357_v54, 1  ;;  %v382_v60 = vmax.f32 %v380_v50, %v381_v55  ;;  %v372_v63 = vrot.slane %v371_v56, 4 }
 0x1cb   :  { %v389_v0 = vsub.f32 %v345_v9, %v368_v57  ;;  %v390_v7 = vsub.f32 %v346_v15, %v368_v57  ;;  %v359_v8 = vmax.f32 %v357_v54, %v358_v59  ;;  %v383_v11 = vrot.slane %v382_v60, 2 }
 0x1cc   :  { %v373_v13 = vmax.f32 %v371_v56, %v372_v63  ;;  %v417_v56 = vunpack.c.l.bf16 %v1131_v5 }
 0x1cd   :  { %v399_v16 = vmul.f32 1.442695, %v389_v0  ;;  %v401_v17 = vmul.f32 1.442695, %v390_v7  ;;  %v387_v20 = vsub.f32 %v343_v14, %v359_v8  ;;  %v388_v21 = vsub.f32 %v344_v22, %v359_v8 }
 0x1ce   :  { %v384_v23 = vmax.f32 %v382_v60, %v383_v11  ;;  %v374_v24 = vrot.slane %v373_v13, 2  ;;  %v418_v60 = vunpack.c.h.bf16 %v1131_v5  ;;  %v415_v7 = vunpack.c.l.bf16 %v1120_v4 }
 0x1cf   :  { %944 = vpow2.f32 %v399_v16  ;;  %v395_v26 = vmul.f32 1.442695, %v387_v20  ;;  %v397_v27 = vmul.f32 1.442695, %v388_v21  ;;  %v416_v16 = vunpack.c.h.bf16 %v1120_v4 }
 0x1d0   :  { %946 = vpow2.f32 %v401_v17  ;;  %v385_v28 = vrot.slane %v384_v23, 1  ;;  %v375_v30 = vmax.f32 %v373_v13, %v374_v24 }
 0x1d1   :  { %948 = vpow2.f32 %v395_v26 }
 0x1d2   :  { %950 = vpow2.f32 %v397_v27  ;;  %v386_v31 = vmax.f32 %v384_v23, %v385_v28  ;;  %v376_v9 = vrot.slane %v375_v30, 1 }
 0x1d4   :  { %v393_v15 = vsub.f32 %v349_v34, %v386_v31  ;;  %v394_v32 = vsub.f32 %v350_v41, %v386_v31  ;;  %v377_v33 = vmax.f32 %v375_v30, %v376_v9 }
 0x1d6   :  { %v407_v36 = vmul.f32 1.442695, %v393_v15  ;;  %v409_v37 = vmul.f32 1.442695, %v394_v32  ;;  %v391_v38 = vsub.f32 %v347_v40, %v377_v33  ;;  %v392_v14 = vsub.f32 %v348_v47, %v377_v33 }
 0x1d7   :  { %v414_v40 = vunpack.c.h.bf16 %v1115_v3 }
 0x1d8   :  { %952 = vpow2.f32 %v407_v36  ;;  %v403_v22 = vmul.f32 1.442695, %v391_v38  ;;  %v405_v39 = vmul.f32 1.442695, %v392_v14 }
 0x1d9   :  { %954 = vpow2.f32 %v409_v37 }
 0x1da   :  { %956 = vpow2.f32 %v403_v22 }
 0x1db   :  { %958 = vpow2.f32 %v405_v39 }
 0x1dc   :  { %v945_v42 = vpop.eup %944 }
 0x1dd   :  { %v947_v45 = vpop.eup %946  ;;  %v472_v34 = vsel %vm120_vm0, %v945_v42, 0.0  ;;  %v421_v57 = vmul.f32 %v945_v42, %v413_v46 }
 0x1de   :  { %v949_v41 = vpop.eup %948  ;;  %v473_v47 = vsel %vm120_vm0, %v947_v45, 0.0  ;;  %v422_v59 = vmul.f32 %v947_v45, %v414_v40 }
 0x1df   :  { %v951_v48 = vpop.eup %950  ;;  %v474_v49 = vadd.f32 %v473_v47, %v472_v34  ;;  %v463_v50 = vsel %vm120_vm0, %v949_v41, 0.0  ;;  %v419_v51 = vmul.f32 %v949_v41, %v411_v43  ;;  %v436_v27 = vsel %vm120_vm0, %v421_v57, 0.0 }
 0x1e0   :  { %v420_v52 = vmul.f32 %v951_v48, %v412_v44  ;;  %v464_v53 = vsel %vm120_vm0, %v951_v48, 0.0  ;;  %v437_v23 = vsel %vm120_vm0, %v422_v59, 0.0 }
 0x1e1   :  { %v475_v54 = vrot.slane %v474_v49, 4  ;;  %v465_v55 = vadd.f32 %v464_v53, %v463_v50  ;;  %v427_v11 = vsel %vm120_vm0, %v419_v51, 0.0  ;;  %v438_v51 = vadd.f32 %v437_v23, %v436_v27 }
 0x1e2   :  { %v428_v8 = vsel %vm120_vm0, %v420_v52, 0.0 }
 0x1e3   :  { %v476_v63 = vadd.f32 %v475_v54, %v474_v49  ;;  %v466_v0 = vrot.slane %v465_v55, 4  ;;  %v429_v15 = vadd.f32 %v428_v8, %v427_v11  ;;  %v439_v11 = vrot.slane %v438_v51, 4 }
 0x1e5   :  { %v953_v13 = vpop.eup %952  ;;  %v477_v17 = vrot.slane %v476_v63, 2  ;;  %v467_v20 = vadd.f32 %v466_v0, %v465_v55  ;;  %v430_v57 = vrot.slane %v429_v15, 4 }
 0x1e6   :  { %v955_v21 = vpop.eup %954  ;;  %v490_v24 = vsel %vm120_vm0, %v953_v13, 0.0  ;;  %v425_v26 = vmul.f32 %v953_v13, %v417_v56 }
 0x1e7   :  { %v957_v28 = vpop.eup %956  ;;  %v468_v30 = vrot.slane %v467_v20, 2  ;;  %v491_v31 = vsel %vm120_vm0, %v955_v21, 0.0  ;;  %v426_v9 = vmul.f32 %v955_v21, %v418_v60  ;;  %v478_v14 = vadd.f32 %v477_v17, %v476_v63 }
 0x1e8   :  { %v959_v32 = vpop.eup %958  ;;  %v492_v33 = vadd.f32 %v491_v31, %v490_v24  ;;  %v481_v36 = vsel %vm120_vm0, %v957_v28, 0.0  ;;  %v423_v37 = vmul.f32 %v957_v28, %v415_v7  ;;  %v454_v38 = vsel %vm120_vm0, %v425_v26, 0.0 }
 0x1e9   :  { %v469_v22 = vadd.f32 %v468_v30, %v467_v20  ;;  %v424_v39 = vmul.f32 %v959_v32, %v416_v16  ;;  %v482_v42 = vsel %vm120_vm0, %v959_v32, 0.0  ;;  %v455_v47 = vsel %vm120_vm0, %v426_v9, 0.0 }
 0x1ea   :  { %v493_v45 = vrot.slane %v492_v33, 4  ;;  %v483_v34 = vadd.f32 %v482_v42, %v481_v36  ;;  %v445_v41 = vsel %vm120_vm0, %v423_v37, 0.0  ;;  %v456_v50 = vadd.f32 %v455_v47, %v454_v38 }
 0x1eb   :  { %v470_v48 = vrot.slane %v469_v22, 1  ;;  %v446_v49 = vsel %vm120_vm0, %v424_v39, 0.0  ;;  %v479_v55 = vrot.slane %v478_v14, 1  ;;  %v431_v24 = vadd.f32 %v430_v57, %v429_v15 }
 0x1ec   :  { %v494_v52 = vadd.f32 %v493_v45, %v492_v33  ;;  %v484_v53 = vrot.slane %v483_v34, 4  ;;  %v447_v54 = vadd.f32 %v446_v49, %v445_v41  ;;  %v457_v0 = vrot.slane %v456_v50, 4 }
 0x1ed   :  { %v471_v8 = vadd.f32 %v470_v48, %v469_v22  ;;  %v480_v21 = vadd.f32 %v479_v55, %v478_v14  ;;  %v440_v31 = vadd.f32 %v439_v11, %v438_v51  ;;  %v432_v32 = vrot.slane %v431_v24, 2 }
 0x1ee   :  { %v495_v59 = vrot.slane %v494_v52, 2  ;;  %v485_v63 = vadd.f32 %v484_v53, %v483_v34  ;;  %v448_v20 = vrot.slane %v447_v54, 4  ;;  %v458_v28 = vadd.f32 %v457_v0, %v456_v50 }
 0x1ef   :  { %960 = vrcp.f32 %v471_v8  ;;  %v441_v37 = vrot.slane %v440_v31, 2  ;;  %v433_v22 = vadd.f32 %v432_v32, %v431_v24 }
 0x1f0   :  { %v496_v13 = vadd.f32 %v495_v59, %v494_v52  ;;  %v486_v17 = vrot.slane %v485_v63, 2  ;;  %v449_v27 = vadd.f32 %v448_v20, %v447_v54  ;;  %962 = vrcp.f32 %v480_v21 }
 0x1f1   :  { %v459_v33 = vrot.slane %v458_v28, 2  ;;  %v442_v14 = vadd.f32 %v441_v37, %v440_v31  ;;  %v434_v42 = vrot.slane %v433_v22, 1 }
 0x1f2   :  { %v487_v26 = vadd.f32 %v486_v17, %v485_v63  ;;  %v497_v30 = vrot.slane %v496_v13, 1  ;;  %v450_v38 = vrot.slane %v449_v27, 2 }
 0x1f3   :  { %v460_v39 = vadd.f32 %v459_v33, %v458_v28  ;;  %v443_v34 = vrot.slane %v442_v14, 1  ;;  %v435_v48 = vadd.f32 %v434_v42, %v433_v22 }
 0x1f4   :  { %v488_v23 = vrot.slane %v487_v26, 1  ;;  %v498_v9 = vadd.f32 %v497_v30, %v496_v13  ;;  %v451_v15 = vadd.f32 %v450_v38, %v449_v27  ;;  %v827_v13 = vld [vmem:[%s1318_s5 + $0x1] ss:$0 sm:$0xff]  ;;  %s1064_s5 = smov 32  }
 0x1f5   :  { %v461_v45 = vrot.slane %v460_v39, 1  ;;  %v444_v52 = vadd.f32 %v443_v34, %v442_v14 }
 0x1f6   :  { %v489_v36 = vadd.f32 %v488_v23, %v487_v26  ;;  %964 = vrcp.f32 %v498_v9  ;;  %v452_v47 = vrot.slane %v451_v15, 1 }
 0x1f7   :  { %v462_v50 = vadd.f32 %v461_v45, %v460_v39 }
 0x1f8   :  { %966 = vrcp.f32 %v489_v36  ;;  %v453_v54 = vadd.f32 %v452_v47, %v451_v15 }
 0x1fc   :  { %v961_v41 = vpop.eup %960 }
 0x1fd   :  { %v963_v49 = vpop.eup %962  ;;  %v503_v53 = vmul.f32 %v961_v41, %v435_v48 }
 0x1fe   :  { %v504_v59 = vmul.f32 %v963_v49, %v444_v52 }
 0x200   :  { %v774_v0 = vsel %vm773_vm2, %v504_v59, %v503_v53 }
 0x203   :  { %v965_v51 = vpop.eup %964 }
 0x204   :  { %v506_v55 = vmul.f32 %v965_v51, %v462_v50 }
 0x205   :  { %v967_v57 = vpop.eup %966 }
 0x206   :  { %v505_v63 = vmul.f32 %v967_v57, %v453_v54 }
 0x208   :  { %v776_v8 = vsel %vm775_vm3, %v505_v63, %v774_v0 }
 0x209   :  { %v1244_v11 = vsel %vm777_vm4, %v506_v55, %v776_v8 }
 0x229   :  { %v894_v17 = vpop.f32.mrf.mxu1 }
 0x22a   :  { %v591_v20 = vadd.f32 %v894_v17, %v827_v13 }
 0x22b   :  { %v582_v21 = vpop.f32.mrf.mxu1 }
 0x22c   :  { %v583_v24 = vadd.f32 %v827_v13, %v582_v21  ;;  %v615_v28 = vadd.f32 %v920_v62, %v591_v20 }
 0x22d   :  { %v895_v26 = vpop.f32.mrf.mxu1 }
 0x22e   :  { %v594_v30 = vadd.f32 %v895_v26, %v827_v13  ;;  %v613_v23 = vadd.f32 %v914_v6, %v583_v24  ;;  %v630_v33 = vsel %vm120_vm0, %v615_v28, -inf }
 0x22f   :  { %v585_v31 = vpop.f32.mrf.mxu1 }
 0x230   :  { %v616_v27 = vadd.f32 %v921_v1, %v594_v30  ;;  %v586_v9 = vadd.f32 %v827_v13, %v585_v31  ;;  %v621_v39 = vsel %vm120_vm0, %v613_v23, -inf }
 0x231   :  { %v898_v32 = vpop.f32.mrf.mxu1 }
 0x232   :  { %v631_v36 = vsel %vm120_vm0, %v616_v27, -inf  ;;  %v614_v37 = vadd.f32 %v915_v10, %v586_v9  ;;  %v607_v38 = vadd.f32 %v898_v32, %v827_v13 }
 0x233   :  { %v632_v22 = vmax.f32 %v630_v33, %v631_v36  ;;  %v598_v62 = vpop.f32.mrf.mxu1 }
 0x234   :  { %v622_v14 = vsel %vm120_vm0, %v614_v37, -inf  ;;  %v599_v6 = vadd.f32 %v827_v13, %v598_v62  ;;  %v619_v42 = vadd.f32 %v930_v18, %v607_v38 }
 0x235   :  { %v633_v15 = vrot.slane %v632_v22, 4  ;;  %v623_v58 = vmax.f32 %v621_v39, %v622_v14  ;;  %v899_v1 = vpop.f32.mrf.mxu1 }
 0x236   :  { %v610_v45 = vadd.f32 %v899_v1, %v827_v13  ;;  %v617_v61 = vadd.f32 %v925_v29, %v599_v6  ;;  %v648_v51 = vsel %vm120_vm0, %v619_v42, -inf }
 0x237   :  { %v634_v34 = vmax.f32 %v632_v22, %v633_v15  ;;  %v624_v41 = vrot.slane %v623_v58, 4  ;;  %v601_v47 = vpop.f32.mrf.mxu1 }
 0x238   :  { %v620_v10 = vadd.f32 %v931_v25, %v610_v45  ;;  %v602_v48 = vadd.f32 %v827_v13, %v601_v47  ;;  %v639_v57 = vsel %vm120_vm0, %v617_v61, -inf }
 0x239   :  { %v635_v49 = vrot.slane %v634_v34, 2  ;;  %v625_v50 = vmax.f32 %v623_v58, %v624_v41 }
 0x23a   :  { %v649_v52 = vsel %vm120_vm0, %v620_v10, -inf  ;;  %v618_v18 = vadd.f32 %v926_v35, %v602_v48 }
 0x23b   :  { %v636_v53 = vmax.f32 %v634_v34, %v635_v49  ;;  %v626_v54 = vrot.slane %v625_v50, 2  ;;  %v650_v55 = vmax.f32 %v648_v51, %v649_v52 }
 0x23c   :  { %v640_v29 = vsel %vm120_vm0, %v618_v18, -inf }
 0x23d   :  { %v637_v59 = vrot.slane %v636_v53, 1  ;;  %v627_v12 = vmax.f32 %v625_v50, %v626_v54  ;;  %v651_v25 = vrot.slane %v650_v55, 4  ;;  %v641_v63 = vmax.f32 %v639_v57, %v640_v29 }
 0x23f   :  { %v638_v0 = vmax.f32 %v636_v53, %v637_v59  ;;  %v628_v8 = vrot.slane %v627_v12, 1  ;;  %v652_v13 = vmax.f32 %v650_v55, %v651_v25  ;;  %v642_v17 = vrot.slane %v641_v63, 4 }
 0x241   :  { %v659_v20 = vsub.f32 %v615_v28, %v638_v0  ;;  %v660_v21 = vsub.f32 %v616_v27, %v638_v0  ;;  %v629_v24 = vmax.f32 %v627_v12, %v628_v8  ;;  %v653_v19 = vrot.slane %v652_v13, 2 }
 0x242   :  { %v643_v35 = vmax.f32 %v641_v63, %v642_v17 }
 0x243   :  { %v669_v26 = vmul.f32 1.442695, %v659_v20  ;;  %v671_v30 = vmul.f32 1.442695, %v660_v21  ;;  %v657_v31 = vsub.f32 %v613_v23, %v629_v24  ;;  %v658_v9 = vsub.f32 %v614_v37, %v629_v24 }
 0x244   :  { %v654_v32 = vmax.f32 %v652_v13, %v653_v19  ;;  %v644_v33 = vrot.slane %v643_v35, 2 }
 0x245   :  { %968 = vpow2.f32 %v669_v26  ;;  %v665_v36 = vmul.f32 1.442695, %v657_v31  ;;  %v667_v38 = vmul.f32 1.442695, %v658_v9 }
 0x246   :  { %970 = vpow2.f32 %v671_v30  ;;  %v655_v22 = vrot.slane %v654_v32, 1  ;;  %v645_v62 = vmax.f32 %v643_v35, %v644_v33 }
 0x247   :  { %972 = vpow2.f32 %v665_v36 }
 0x248   :  { %974 = vpow2.f32 %v667_v38  ;;  %v656_v39 = vmax.f32 %v654_v32, %v655_v22  ;;  %v646_v28 = vrot.slane %v645_v62, 1 }
 0x24a   :  { %v663_v27 = vsub.f32 %v619_v42, %v656_v39  ;;  %v664_v14 = vsub.f32 %v620_v10, %v656_v39  ;;  %v647_v6 = vmax.f32 %v645_v62, %v646_v28 }
 0x24c   :  { %v677_v15 = vmul.f32 1.442695, %v663_v27  ;;  %v679_v58 = vmul.f32 1.442695, %v664_v14  ;;  %v661_v1 = vsub.f32 %v617_v61, %v647_v6  ;;  %v662_v23 = vsub.f32 %v618_v18, %v647_v6 }
 0x24e   :  { %976 = vpow2.f32 %v677_v15  ;;  %v673_v37 = vmul.f32 1.442695, %v661_v1  ;;  %v675_v45 = vmul.f32 1.442695, %v662_v23 }
 0x24f   :  { %978 = vpow2.f32 %v679_v58 }
 0x250   :  { %980 = vpow2.f32 %v673_v37 }
 0x251   :  { %982 = vpow2.f32 %v675_v45 }
 0x252   :  { %v969_v34 = vpop.eup %968 }
 0x253   :  { %v971_v41 = vpop.eup %970  ;;  %v734_v47 = vsel %vm120_vm0, %v969_v34, 0.0  ;;  %v683_v55 = vmul.f32 %v969_v34, %v413_v46 }
 0x254   :  { %v973_v48 = vpop.eup %972  ;;  %v735_v49 = vsel %vm120_vm0, %v971_v41, 0.0  ;;  %v684_v54 = vmul.f32 %v971_v41, %v414_v40 }
 0x255   :  { %v975_v42 = vpop.eup %974  ;;  %v736_v10 = vadd.f32 %v735_v49, %v734_v47  ;;  %v725_v50 = vsel %vm120_vm0, %v973_v48, 0.0  ;;  %v681_v52 = vmul.f32 %v973_v48, %v411_v43  ;;  %v698_v43 = vsel %vm120_vm0, %v683_v55, 0.0 }
 0x256   :  { %v682_v61 = vmul.f32 %v975_v42, %v412_v44  ;;  %v726_v51 = vsel %vm120_vm0, %v975_v42, 0.0  ;;  %v699_v8 = vsel %vm120_vm0, %v684_v54, 0.0 }
 0x257   :  { %v737_v18 = vrot.slane %v736_v10, 4  ;;  %v727_v53 = vadd.f32 %v726_v51, %v725_v50  ;;  %v689_v59 = vsel %vm120_vm0, %v681_v52, 0.0  ;;  %v700_v36 = vadd.f32 %v699_v8, %v698_v43 }
 0x258   :  { %v690_v12 = vsel %vm120_vm0, %v682_v61, 0.0 }
 0x259   :  { %v738_v57 = vadd.f32 %v737_v18, %v736_v10  ;;  %v728_v29 = vrot.slane %v727_v53, 4  ;;  %v691_v17 = vadd.f32 %v690_v12, %v689_v59 }
 0x25b   :  { %v977_v44 = vpop.eup %976  ;;  %v739_v25 = vrot.slane %v738_v57, 2  ;;  %v729_v63 = vadd.f32 %v728_v29, %v727_v53  ;;  %v692_v27 = vrot.slane %v691_v17, 4 }
 0x25c   :  { %v979_v0 = vpop.eup %978  ;;  %v752_v2 = vsel %vm120_vm0, %v977_v44, 0.0  ;;  %v687_v46 = vmul.f32 %v977_v44, %v417_v56 }
 0x25d   :  { %v981_v40 = vpop.eup %980  ;;  %v730_v13 = vrot.slane %v729_v63, 2  ;;  %v753_v3 = vsel %vm120_vm0, %v979_v0, 0.0  ;;  %v740_v21 = vadd.f32 %v739_v25, %v738_v57  ;;  %v688_v9 = vmul.f32 %v979_v0, %v418_v60 }
 0x25e   :  { %v983_v20 = vpop.eup %982  ;;  %v754_v24 = vadd.f32 %v753_v3, %v752_v2  ;;  %v743_v19 = vsel %vm120_vm0, %v981_v40, 0.0  ;;  %v685_v35 = vmul.f32 %v981_v40, %v415_v7  ;;  %v716_v7 = vsel %vm120_vm0, %v687_v46, 0.0 }
 0x25f   :  { %v731_v26 = vadd.f32 %v730_v13, %v729_v63  ;;  %v744_v30 = vsel %vm120_vm0, %v983_v20, 0.0  ;;  %v686_v31 = vmul.f32 %v983_v20, %v416_v16  ;;  %v741_v28 = vrot.slane %v740_v21, 1 }
 0x260   :  { %v755_v32 = vrot.slane %v754_v24, 4  ;;  %v745_v56 = vadd.f32 %v744_v30, %v743_v19  ;;  %v707_v38 = vsel %vm120_vm0, %v685_v35, 0.0  ;;  %v717_v4 = vsel %vm120_vm0, %v688_v9, 0.0 }
 0x261   :  { %v732_v33 = vrot.slane %v731_v26, 1  ;;  %v708_v22 = vsel %vm120_vm0, %v686_v31, 0.0  ;;  %v701_v60 = vrot.slane %v700_v36, 4  ;;  %v718_v6 = vadd.f32 %v717_v4, %v716_v7 }
 0x262   :  { %v756_v62 = vadd.f32 %v755_v32, %v754_v24  ;;  %v746_v39 = vrot.slane %v745_v56, 4  ;;  %v709_v14 = vadd.f32 %v708_v22, %v707_v38  ;;  %v693_v37 = vadd.f32 %v692_v27, %v691_v17 }
 0x263   :  { %v733_v15 = vadd.f32 %v732_v33, %v731_v26  ;;  %v719_v45 = vrot.slane %v718_v6, 4  ;;  %v742_v34 = vadd.f32 %v741_v28, %v740_v21  ;;  %v702_v48 = vadd.f32 %v701_v60, %v700_v36 }
 0x264   :  { %v757_v16 = vrot.slane %v756_v62, 2  ;;  %v747_v5 = vadd.f32 %v746_v39, %v745_v56  ;;  %v710_v1 = vrot.slane %v709_v14, 4  ;;  %v694_v50 = vrot.slane %v693_v37, 2 }
 0x265   :  { %984 = vrcp.f32 %v733_v15  ;;  %v720_v61 = vadd.f32 %v719_v45, %v718_v6  ;;  %v703_v52 = vrot.slane %v702_v48, 2 }
 0x266   :  { %v748_v58 = vrot.slane %v747_v5, 2  ;;  %v758_v23 = vadd.f32 %v757_v16, %v756_v62  ;;  %v711_v49 = vadd.f32 %v710_v1, %v709_v14  ;;  %986 = vrcp.f32 %v742_v34 }
 0x267   :  { %v695_v53 = vadd.f32 %v694_v50, %v693_v37  ;;  %v721_v54 = vrot.slane %v720_v61, 2  ;;  %v704_v55 = vadd.f32 %v703_v52, %v702_v48 }
 0x268   :  { %v749_v41 = vadd.f32 %v748_v58, %v747_v5  ;;  %v759_v47 = vrot.slane %v758_v23, 1  ;;  %v712_v18 = vrot.slane %v711_v49, 2 }
 0x269   :  { %v696_v29 = vrot.slane %v695_v53, 1  ;;  %v722_v59 = vadd.f32 %v721_v54, %v720_v61  ;;  %v705_v12 = vrot.slane %v704_v55, 1 }
 0x26a   :  { %v750_v42 = vrot.slane %v749_v41, 1  ;;  %v760_v10 = vadd.f32 %v759_v47, %v758_v23  ;;  %v713_v57 = vadd.f32 %v712_v18, %v711_v49 }
 0x26b   :  { %v697_v63 = vadd.f32 %v696_v29, %v695_v53  ;;  %v723_v0 = vrot.slane %v722_v59, 1  ;;  %v706_v43 = vadd.f32 %v705_v12, %v704_v55 }
 0x26c   :  { %v751_v51 = vadd.f32 %v750_v42, %v749_v41  ;;  %988 = vrcp.f32 %v760_v10  ;;  %v714_v25 = vrot.slane %v713_v57, 1 }
 0x26d   :  { %v724_v46 = vadd.f32 %v723_v0, %v722_v59 }
 0x26e   :  { %990 = vrcp.f32 %v751_v51  ;;  %v715_v13 = vadd.f32 %v714_v25, %v713_v57 }
 0x272   :  { %v985_v44 = vpop.eup %984 }
 0x273   :  { %v987_v2 = vpop.eup %986  ;;  %v765_v8 = vmul.f32 %v985_v44, %v697_v63 }
 0x274   :  { %v766_v17 = vmul.f32 %v987_v2, %v706_v43 }
 0x276   :  { %v784_v24 = vsel %vm773_vm2, %v766_v17, %v765_v8 }
 0x279   :  { %v989_v40 = vpop.eup %988 }
 0x27a   :  { %v768_v21 = vmul.f32 %v989_v40, %v724_v46 }
 0x27b   :  { %v991_v3 = vpop.eup %990 }
 0x27c   :  { %v767_v20 = vmul.f32 %v991_v3, %v715_v13 }
 0x27e   :  { %v785_v19 = vsel %vm775_vm3, %v767_v20, %v784_v24 }
 0x27f   :  { %v786_v35 = vsel %vm777_vm4, %v768_v21, %v785_v19 }
 0x280   :  { %787 = vrot.lane.b32.xlu1 %v786_v35, %s1064_s5 }
 0x2f2   :  { %v788_v26 = vpop.permute.xlu1 %787 }
 0x2f3   :  { %v790_v30 = vsel %vm120_vm0, %v1244_v11, %v788_v26 }
 0x2f4   :  { %792 = vst.msk [vmem:[#allocation7] sm:$0xf] %vm791_vm5, %v790_v30 }
 0x2f5   :  { %1043 = shalt.err (!%p1040_p0)
}
 0x2f6   :  { %802 = dma.vmem_to_hbm [thread:$0]  %s800_s28, 64, %s1319_s6, [#allocation4]  }
 0x2f7   :  { %1056 = dma.done.wait [#allocation4], 64  }
 0x2f8   :  { %1057 = vsyncadd [#allocation4], 4294967232 }
 0x2f9   :  { %806 = vsyncpa [#allocation3], 1 }
 0x2fa   :  { %807 = vsyncpa [#allocation6], 1 }
 0x2fb   :  { %808 = vsyncpa [#allocation4], 1 }

</bundles_post_ra>
